<compile_context>
chip_gen: v7x
topology: tpu7x:2x2x1
jax: 0.10.0
libtpu: 0.0.40
codegen_flags: <defaults>
</compile_context>

<pallas_src>
import math
from functools import partial

import jax
import jax.numpy as jnp
from jax.experimental import pallas as pl
from jax.experimental.pallas import tpu as pltpu


def _round_up(x, m):
    return (x + m - 1) // m * m


def _vmem_limit_bytes():
    """Generation-aware scoped-VMEM limit: ~64 MiB on 128 MiB parts, ~35 MiB on v7x."""
    cap = 128 << 20
    try:
        info = pltpu.get_tpu_info()
        cap = int(getattr(info, "vmem_capacity_bytes", cap))
    except Exception:
        pass
    return max(16 << 20, min(64 << 20, int(cap * 0.55)))


def _choose_block_rows(rows, per_row_bytes, fixed_bytes, vmem_limit, override=None):
    """Largest multiple-of-8 row block whose padded footprint fits the VMEM budget."""
    if override is not None:
        rb = max(1, min(override, rows))
    else:
        budget = max(int(vmem_limit * 0.6) - fixed_bytes, per_row_bytes * 8)
        rb = budget // max(per_row_bytes, 1)
        if rows >= 16:                      # keep >=2 grid steps (pipelining / v7x megacore)
            rb = min(rb, rows // 2)
        rb = min(rb, rows)
    if rb >= rows:
        return rows                         # single full block (always legal)
    return max(8, (rb // 8) * 8)


def _banded_weight(w, T, T_out):
    """(K, C_in, C_out) conv weight -> (T*C_in, T_out*C_out) block-Toeplitz matrix."""
    K, C_in, C_out = w.shape
    wkc = w.reshape(K * C_in, C_out)
    Wb = jnp.zeros((T * C_in, T_out * C_out), w.dtype)
    for t in range(T_out):
        Wb = Wb.at[t * C_in:(t + K) * C_in, t * C_out:(t + 1) * C_out].set(wkc)
    return Wb


def _time_block_kernel(w1_ref, w2_ref, w3_ref, b1_ref, b2_ref, b3_ref,
                       x_ref, o_ref, *, approx_gate):
    # x_ref : (RB, T*C_in)            one row block (rows = batch * node)
    # w*_ref: (T*C_in, T_out*C_out)   banded conv weights (grid-invariant)
    # b*_ref: (1, T_out*C_out)
    # o_ref : (RB, T_out*C_out)       lane-dense output slab
    x = x_ref[...]
    y1 = jnp.dot(x, w1_ref[...], preferred_element_type=jnp.float32) + b1_ref[...]
    y2 = jnp.dot(x, w2_ref[...], preferred_element_type=jnp.float32) + b2_ref[...]
    y3 = jnp.dot(x, w3_ref[...], preferred_element_type=jnp.float32) + b3_ref[...]
    if approx_gate:
        # sigmoid via EUP exp + approx reciprocal (keeps the divide off VALU/store slots)
        gate = pl.reciprocal(1.0 + jnp.exp(-y2), approx=True)
    else:
        gate = jax.nn.sigmoid(y2)
    o_ref[...] = jnp.maximum(y1 * gate + y3, 0.0).astype(o_ref.dtype)


def time_block_forward(X, w1, b1, w2, b2, w3, b3, *, block_rows=None,
                       approx_gate=False):
    """TimeBlock forward. X: (B, N, T, C_in); w_i: (K, C_in, C_out); b_i: (C_out,)."""
    B, N, T, C_in = X.shape
    K, _, C_out = w1.shape
    T_out = T - K + 1
    assert T_out >= 1

    rows = B * N
    n_in = T * C_in
    n_out = T_out * C_out

    # Banded weights/biases built once in the wrapper (tiny).
    Wb = [_banded_weight(w, T, T_out) for w in (w1, w2, w3)]
    Bb = [jnp.tile(b, T_out).reshape(1, n_out) for b in (b1, b2, b3)]

    # Lane-dense 2-D input slab: row-major collapse, no HBM copy.
    x2d = X.reshape(rows, n_in)

    # ---- VMEM accounting from the real (8,128)-padded block footprint ----
    vmem_limit = _vmem_limit_bytes()
    itemsize = X.dtype.itemsize
    in_cols_p = _round_up(n_in, 128)
    out_cols_p = _round_up(n_out, 128)
    # double-buffered x/o blocks + ~4 f32 epilogue temporaries per row
    per_row = 2 * itemsize * (in_cols_p + out_cols_p) + 4 * 4 * out_cols_p
    # grid-invariant weight/bias blocks (double-buffered by default)
    fixed = 2 * 3 * (_round_up(n_in, 8) + 8) * out_cols_p * 4
    RB = _choose_block_rows(rows, per_row, fixed, vmem_limit, block_rows)

    kernel = partial(_time_block_kernel, approx_gate=approx_gate)
    inv = lambda r: (0, 0)   # grid-invariant blocks -> never re-DMA'd

    out2d = pl.pallas_call(
        kernel,
        out_shape=jax.ShapeDtypeStruct((rows, n_out), X.dtype),
        grid_spec=pltpu.PrefetchScalarGridSpec(
            num_scalar_prefetch=0,
            grid=(pl.cdiv(rows, RB),),
            in_specs=[
                pl.BlockSpec((n_in, n_out), inv),
                pl.BlockSpec((n_in, n_out), inv),
                pl.BlockSpec((n_in, n_out), inv),
                pl.BlockSpec((1, n_out), inv),
                pl.BlockSpec((1, n_out), inv),
                pl.BlockSpec((1, n_out), inv),
                pl.BlockSpec((RB, n_in), lambda r: (r, 0)),
            ],
            out_specs=pl.BlockSpec((RB, n_out), lambda r: (r, 0)),
        ),
        compiler_params=pltpu.CompilerParams(
            dimension_semantics=("parallel",),
            vmem_limit_bytes=vmem_limit,
        ),
    )(*Wb, *Bb, x2d)

    # Row-major expand back to (B, N, T_out, C_out): free view.
    return out2d.reshape(B, N, T_out, C_out)


def time_block_reference(X, w1, b1, w2, b2, w3, b3):
    """Pure-JAX reference matching the PyTorch TimeBlock forward."""
    K = w1.shape[0]
    T_out = X.shape[2] - K + 1

    def conv(w, b):
        acc = jnp.zeros(X.shape[:2] + (T_out, w.shape[-1]), jnp.float32)
        for k in range(K):
            acc = acc + jnp.einsum("bntc,cd->bntd", X[:, :, k:k + T_out, :], w[k])
        return acc + b

    c1, c2, c3 = conv(w1, b1), conv(w2, b2), conv(w3, b3)
    return jnp.maximum(c1 * jax.nn.sigmoid(c2) + c3, 0.0).astype(X.dtype)


def make_time_block_params(in_channels, out_channels, kernel_size, key,
                           dtype=jnp.float32):
    """Conv2d-style uniform(-1/sqrt(fan_in), 1/sqrt(fan_in)) init for the 3 convs."""
    bound = 1.0 / math.sqrt(in_channels * kernel_size)
    keys = jax.random.split(key, 6)
    params = []
    for i in range(3):
        w = jax.random.uniform(keys[2 * i], (kernel_size, in_channels, out_channels),
                               dtype, -bound, bound)
        b = jax.random.uniform(keys[2 * i + 1], (out_channels,), dtype, -bound, bound)
        params += [w, b]
    return tuple(params)


if __name__ == "__main__":
    batch = 2
    num_nodes = 16
    num_timesteps = 8
    in_channels = 4
    out_channels = 32
    kernel_size = 3

    key = jax.random.PRNGKey(0)
    k_x, k_p = jax.random.split(key)

    X = jax.random.normal(
        k_x, (batch, num_nodes, num_timesteps, in_channels), jnp.float32)
    w1, b1, w2, b2, w3, b3 = make_time_block_params(
        in_channels, out_channels, kernel_size, k_p)

    out = time_block_forward(X, w1, b1, w2, b2, w3, b3)
    out = jax.block_until_ready(out)

    ref = time_block_reference(X, w1, b1, w2, b2, w3, b3)
    assert out.shape == (batch, num_nodes,
                         num_timesteps - kernel_size + 1, out_channels)
    assert jnp.allclose(out, ref, atol=1e-4, rtol=1e-4)

    print("KERNEL_OK")
</pallas_src>

<mosaic_0001>
module attributes {stable_mosaic.version = 11 : i64} {
  func.func @_time_block_kernel(%arg0: i32, %arg1: memref<32x192xf32, #tpu.memory_space<vmem>>, %arg2: memref<32x192xf32, #tpu.memory_space<vmem>>, %arg3: memref<32x192xf32, #tpu.memory_space<vmem>>, %arg4: memref<1x192xf32, #tpu.memory_space<vmem>>, %arg5: memref<1x192xf32, #tpu.memory_space<vmem>>, %arg6: memref<1x192xf32, #tpu.memory_space<vmem>>, %arg7: memref<16x32xf32, #tpu.memory_space<vmem>>, %arg8: memref<16x192xf32, #tpu.memory_space<vmem>>) attributes {dimension_semantics = [#tpu.dimension_semantics<parallel>], iteration_bounds = array<i64: 2>, scalar_prefetch = 0 : i64, scratch_operands = 0 : i64, tpu.core_type = #tpu.core_type<tc>, window_params = [{pipeline_mode = #tpu.pipeline_mode<synchronous>, transform_indices = @transform_0, window_bounds = array<i64: 32, 192>}, {pipeline_mode = #tpu.pipeline_mode<synchronous>, transform_indices = @transform_1, window_bounds = array<i64: 32, 192>}, {pipeline_mode = #tpu.pipeline_mode<synchronous>, transform_indices = @transform_2, window_bounds = array<i64: 32, 192>}, {pipeline_mode = #tpu.pipeline_mode<synchronous>, transform_indices = @transform_3, window_bounds = array<i64: 1, 192>}, {pipeline_mode = #tpu.pipeline_mode<synchronous>, transform_indices = @transform_4, window_bounds = array<i64: 1, 192>}, {pipeline_mode = #tpu.pipeline_mode<synchronous>, transform_indices = @transform_5, window_bounds = array<i64: 1, 192>}, {transform_indices = @transform_6, window_bounds = array<i64: 16, 32>}, {transform_indices = @transform_7, window_bounds = array<i64: 16, 192>}]} {
    %c0 = arith.constant 0 : index
    %c0_0 = arith.constant 0 : index
    %0 = vector.load %arg7[%c0, %c0_0] : memref<16x32xf32, #tpu.memory_space<vmem>>, vector<16x32xf32>
    %c0_1 = arith.constant 0 : index
    %c0_2 = arith.constant 0 : index
    %1 = vector.load %arg1[%c0_1, %c0_2] : memref<32x192xf32, #tpu.memory_space<vmem>>, vector<32x192xf32>
    %cst = arith.constant dense<0.000000e+00> : vector<16x192xf32>
    %2 = tpu.matmul %0, %1, %cst {dimension_numbers = #tpu.dot_dimension_numbers<[1], [0], [0], [1], [0, 0, 1, 1], [], []>} : vector<16x32xf32>, vector<32x192xf32>, vector<16x192xf32> -> vector<16x192xf32>
    %c0_3 = arith.constant 0 : index
    %c0_4 = arith.constant 0 : index
    %3 = vector.load %arg4[%c0_3, %c0_4] : memref<1x192xf32, #tpu.memory_space<vmem>>, vector<1x192xf32>
    %4 = vector.broadcast %3 : vector<1x192xf32> to vector<16x192xf32>
    %5 = arith.addf %2, %4 : vector<16x192xf32>
    %c0_5 = arith.constant 0 : index
    %c0_6 = arith.constant 0 : index
    %6 = vector.load %arg2[%c0_5, %c0_6] : memref<32x192xf32, #tpu.memory_space<vmem>>, vector<32x192xf32>
    %cst_7 = arith.constant dense<0.000000e+00> : vector<16x192xf32>
    %7 = tpu.matmul %0, %6, %cst_7 {dimension_numbers = #tpu.dot_dimension_numbers<[1], [0], [0], [1], [0, 0, 1, 1], [], []>} : vector<16x32xf32>, vector<32x192xf32>, vector<16x192xf32> -> vector<16x192xf32>
    %c0_8 = arith.constant 0 : index
    %c0_9 = arith.constant 0 : index
    %8 = vector.load %arg5[%c0_8, %c0_9] : memref<1x192xf32, #tpu.memory_space<vmem>>, vector<1x192xf32>
    %9 = vector.broadcast %8 : vector<1x192xf32> to vector<16x192xf32>
    %10 = arith.addf %7, %9 : vector<16x192xf32>
    %c0_10 = arith.constant 0 : index
    %c0_11 = arith.constant 0 : index
    %11 = vector.load %arg3[%c0_10, %c0_11] : memref<32x192xf32, #tpu.memory_space<vmem>>, vector<32x192xf32>
    %cst_12 = arith.constant dense<0.000000e+00> : vector<16x192xf32>
    %12 = tpu.matmul %0, %11, %cst_12 {dimension_numbers = #tpu.dot_dimension_numbers<[1], [0], [0], [1], [0, 0, 1, 1], [], []>} : vector<16x32xf32>, vector<32x192xf32>, vector<16x192xf32> -> vector<16x192xf32>
    %c0_13 = arith.constant 0 : index
    %c0_14 = arith.constant 0 : index
    %13 = vector.load %arg6[%c0_13, %c0_14] : memref<1x192xf32, #tpu.memory_space<vmem>>, vector<1x192xf32>
    %14 = vector.broadcast %13 : vector<1x192xf32> to vector<16x192xf32>
    %15 = arith.addf %12, %14 : vector<16x192xf32>
    %16 = arith.negf %10 : vector<16x192xf32>
    %17 = math.exp %16 : vector<16x192xf32>
    %cst_15 = arith.constant 1.000000e+00 : f32
    %18 = vector.broadcast %cst_15 : f32 to vector<16x192xf32>
    %19 = arith.addf %18, %17 : vector<16x192xf32>
    %20 = arith.divf %18, %19 : vector<16x192xf32>
    %21 = arith.mulf %5, %20 : vector<16x192xf32>
    %22 = arith.addf %21, %15 : vector<16x192xf32>
    %cst_16 = arith.constant 0.000000e+00 : f32
    %23 = vector.broadcast %cst_16 : f32 to vector<16x192xf32>
    %24 = arith.maximumf %22, %23 : vector<16x192xf32>
    %c0_17 = arith.constant 0 : index
    %c0_18 = arith.constant 0 : index
    %25 = vector.load %arg8[%c0_17, %c0_18] : memref<16x192xf32, #tpu.memory_space<vmem>>, vector<16x192xf32>
    tpu.vector_store %arg8[%c0_17, %c0_18], %24 {strides = array<i32>} : memref<16x192xf32, #tpu.memory_space<vmem>>, vector<16x192xf32>,
    return
  }
  func.func @transform_0(%arg0: i32) -> (i32, i32) {
    %c0_i32 = arith.constant 0 : i32
    %c0_i32_0 = arith.constant 0 : i32
    %c0_i32_1 = arith.constant 0 : i32
    return %c0_i32, %c0_i32_0 : i32, i32
  }
  func.func @transform_1(%arg0: i32) -> (i32, i32) {
    %c0_i32 = arith.constant 0 : i32
    %c0_i32_0 = arith.constant 0 : i32
    %c0_i32_1 = arith.constant 0 : i32
    return %c0_i32, %c0_i32_0 : i32, i32
  }
  func.func @transform_2(%arg0: i32) -> (i32, i32) {
    %c0_i32 = arith.constant 0 : i32
    %c0_i32_0 = arith.constant 0 : i32
    %c0_i32_1 = arith.constant 0 : i32
    return %c0_i32, %c0_i32_0 : i32, i32
  }
  func.func @transform_3(%arg0: i32) -> (i32, i32) {
    %c0_i32 = arith.constant 0 : i32
    %c0_i32_0 = arith.constant 0 : i32
    %c0_i32_1 = arith.constant 0 : i32
    return %c0_i32, %c0_i32_0 : i32, i32
  }
  func.func @transform_4(%arg0: i32) -> (i32, i32) {
    %c0_i32 = arith.constant 0 : i32
    %c0_i32_0 = arith.constant 0 : i32
    %c0_i32_1 = arith.constant 0 : i32
    return %c0_i32, %c0_i32_0 : i32, i32
  }
  func.func @transform_5(%arg0: i32) -> (i32, i32) {
    %c0_i32 = arith.constant 0 : i32
    %c0_i32_0 = arith.constant 0 : i32
    %c0_i32_1 = arith.constant 0 : i32
    return %c0_i32, %c0_i32_0 : i32, i32
  }
  func.func @transform_6(%arg0: i32) -> (i32, i32) {
    %c0_i32 = arith.constant 0 : i32
    %c0_i32_0 = arith.constant 0 : i32
    return %arg0, %c0_i32 : i32, i32
  }
  func.func @transform_7(%arg0: i32) -> (i32, i32) {
    %c0_i32 = arith.constant 0 : i32
    %c0_i32_0 = arith.constant 0 : i32
    return %arg0, %c0_i32 : i32, i32
  }
}

</mosaic_0001>

<bundles_post_ra>
// kernel: tpu_custom_call.1
= control target key start
LH: loop header
LB: loop body
LE: loop exit
PB: predicated region body
PF: predicated region fallthrough
CT: control target
= control target key end

     0   :  { %12 = vsyncpa [#allocation3], 0  ;;  %s1755_s0 = inlined_call_operand.hbm [shape: f32[32,192], index: 0, kind: input, shape index: {}]   ;;  %s1756_s1 = inlined_call_operand.hbm [shape: f32[32,192], index: 1, kind: input, shape index: {}]   ;;  %s1757_s2 = inlined_call_operand.hbm [shape: f32[32,192], index: 2, kind: input, shape index: {}]   ;;  %s1758_s3 = inlined_call_operand.hbm [shape: f32[1,192], index: 3, kind: input, shape index: {}]   ;;  %s1759_s4 = inlined_call_operand.hbm [shape: f32[1,192], index: 4, kind: input, shape index: {}]   ;;  %s1760_s5 = inlined_call_operand.hbm [shape: f32[1,192], index: 5, kind: input, shape index: {}]   ;;  %s1761_s6 = inlined_call_operand.hbm [shape: f32[32,32], index: 6, kind: input, shape index: {}]   ;;  %s1762_s7 = inlined_call_operand.hbm [shape: f32[32,192], index: 7, kind: output, shape index: {}]  }
   0x1   :  { %13 = vsyncpa [#allocation6], 0 }
   0x2   :  { %14 = vsyncpa [#allocation9], 0 }
   0x3   :  { %15 = vsyncpa [#allocation12], 0 }
   0x4   :  { %16 = vsyncpa [#allocation4], 0 }
   0x5   :  { %18 = vsyncpa [#allocation4 + $0x1], 0  ;;  %s1399_s24 = smov 0   ;;  %s1401_s25 = smov 0  }
   0x6   :  { %s1403_s26 = smov 0   ;;  %s1405_s27 = smov 0  }
   0x7 LB: > { %s1344_s28 = smov [#allocation2]   ;;  %s1420_s30 = sadd.s32 4294967295, %s1342_s27   ;;  %s1342_s27 = sphi %s1405_s27, %s1790_s27   ;;  %s1338_s26 = sphi %s1403_s26, %s1789_s26   ;;  %s1334_s25 = sphi %s1401_s25, %s1788_s25   ;;  %s1330_s24 = sphi %s1399_s24, %s1787_s24  }
   0x8   : > { %s219_s29 = sshll.u32 %s1344_s28, 4  ;;  %p865_p0 = scmp.ge.s32.totalorder %s1342_s27, 1  ;;  %s1425_s29 = int_to_ptr.vmem [resolvable:$true] %s219_s29 }
   0x9   : > { %p1763_p1 = scmp.eq.s32.totalorder %s1420_s30, 0  ;;  %p207_p2 = scmp.lt.s32.totalorder %s1342_s27, 3 }
   0xa   : > { %s1345_s9 = smov [#allocation5]   ;;  %s1346_s12 = smov [#allocation8]  }
   0xb   : > { %p1427_p3 = pnand %p865_p0, %p207_p2  ;;  %s232_s10 = sshll.u32 %s1345_s9, 4  ;;  %s1440_s10 = int_to_ptr.vmem [resolvable:$true] %s232_s10 }
   0xc   : > { %s259_s13 = sshll.u32 %s1346_s12, 4  ;;  %s1062_s16 = scalar_lea.hbm %s1755_s0, 1024  ;;  %s1442_s13 = int_to_ptr.vmem [resolvable:$true] %s259_s13 }
   0xd   : > { %s1766_s8 = scalar_select %p1427_p3, 1, 0 }
   0xe   : > { %p960_p5 = pneg %p1427_p3  ;;  %p1063_p7 = scmp.ne.s32.totalorder %s1755_s0, %s1062_s16 }
   0xf   : > { %p1069_p11 = scmp.lt.u32.totalorder %s1062_s16, %s1755_s0 }
  0x10   : > { %p1436_p6 = pnand %p960_p5, %p1763_p1 }
  0x12   : > { %p1452_p8 = pneg %p1436_p6 }
  0x14   : > { %p1065_p9 = pnand %p1452_p8, %p1063_p7 }
  0x16   : > { %p1066_p10 = pneg %p1065_p9 }
  0x18   : > { %p1071_p12 = pnand %p1069_p11, %p1066_p10 }
  0x1a   : > { %1074 = shalt.err (!%p1071_p12)
}
  0x1b   : > { %s1075_s22 = scalar_lea.vmem %s1425_s29, 1024  ;;  %p1083_p5 = scmp.lt.s32.totalorder %s1425_s29, %s1425_s29 }
  0x1c   : > { %p1076_p13 = scmp.ne.s32.totalorder %s1425_s29, %s1075_s22  ;;  %p1084_p4 = scmp.lt.s32.totalorder %s1075_s22, %s1075_s22 }
  0x1e   : > { %p1078_p0 = pnand %p1076_p13, %p1452_p8  ;;  %p1085_p7 = por %p1084_p4, %p1083_p5 }
  0x20   : > { %p1079_p2 = pneg %p1078_p0 }
  0x22   : > { %p1086_p9 = pnand %p1085_p7, %p1079_p2 }
  0x24   : > { %1089 = shalt.err (!%p1086_p9)
}
  0x25   : > { %s1347_s23 = smov 256   ;;  %s1348_s28 = smov 16  }
  0x26   : > { %963 = dma.hbm_to_vmem [thread:$0]  (!%p1436_p6), %s1755_s0, 1024, %s1425_s29, [#allocation3], %s1347_s23, %s1347_s23, %s1348_s28  }
  0x27   : > { %s1090_s16 = scalar_lea.hbm %s1756_s1, 1024 }
  0x28   : > { %p1091_p4 = scmp.ne.s32.totalorder %s1756_s1, %s1090_s16  ;;  %p1097_p12 = scmp.lt.u32.totalorder %s1090_s16, %s1756_s1 }
  0x2a   : > { %p1093_p10 = pnand %p1091_p4, %p1452_p8 }
  0x2c   : > { %p1094_p11 = pneg %p1093_p10 }
  0x2e   : > { %p1099_p13 = pnand %p1097_p12, %p1094_p11 }
  0x30   : > { %1102 = shalt.err (!%p1099_p13)
}
  0x31   : > { %s1103_s29 = scalar_lea.vmem %s1440_s10, 1024  ;;  %p1111_p7 = scmp.lt.s32.totalorder %s1440_s10, %s1440_s10 }
  0x32   : > { %p1104_p0 = scmp.ne.s32.totalorder %s1440_s10, %s1103_s29  ;;  %p1112_p9 = scmp.lt.s32.totalorder %s1103_s29, %s1103_s29 }
  0x34   : > { %p1106_p2 = pnand %p1104_p0, %p1452_p8  ;;  %p1113_p4 = por %p1112_p9, %p1111_p7 }
  0x36   : > { %p1107_p5 = pneg %p1106_p2 }
  0x38   : > { %p1114_p10 = pnand %p1113_p4, %p1107_p5 }
  0x3a   : > { %1117 = shalt.err (!%p1114_p10)
}
  0x3b   : > { %966 = dma.hbm_to_vmem [thread:$0]  (!%p1436_p6), %s1756_s1, 1024, %s1440_s10, [#allocation6], %s1347_s23, %s1347_s23, %s1348_s28  }
  0x3c   : > { %s1118_s15 = scalar_lea.hbm %s1758_s3, 32 }
  0x3d   : > { %p1119_p11 = scmp.ne.s32.totalorder %s1758_s3, %s1118_s15  ;;  %p1125_p0 = scmp.lt.u32.totalorder %s1118_s15, %s1758_s3 }
  0x3f   : > { %p1121_p12 = pnand %p1119_p11, %p1452_p8 }
  0x41   : > { %p1122_p13 = pneg %p1121_p12 }
  0x43   : > { %p1127_p2 = pnand %p1125_p0, %p1122_p13 }
  0x45   : > { %1130 = shalt.err (!%p1127_p2)
}
  0x46   : > { %s1131_s10 = scalar_lea.vmem %s1442_s13, 32  ;;  %p1139_p4 = scmp.lt.s32.totalorder %s1442_s13, %s1442_s13 }
  0x47   : > { %p1132_p5 = scmp.ne.s32.totalorder %s1442_s13, %s1131_s10  ;;  %p1140_p10 = scmp.lt.s32.totalorder %s1131_s10, %s1131_s10 }
  0x49   : > { %p1134_p7 = pnand %p1132_p5, %p1452_p8  ;;  %p1141_p11 = por %p1140_p10, %p1139_p4 }
  0x4b   : > { %p1135_p9 = pneg %p1134_p7 }
  0x4d   : > { %p1142_p12 = pnand %p1141_p11, %p1135_p9 }
  0x4f   : > { %1145 = shalt.err (!%p1142_p12)
}
  0x50   : > { %972 = dma.hbm_to_vmem [thread:$0]  (!%p1436_p6), %s1758_s3, 32, %s1442_s13, [#allocation9]  }
  0x51   : > { %s1349_s22 = smov [#allocation7]   ;;  %s1350_s12 = smov [#allocation10]  }
  0x52   : > { %s245_s9 = sshll.u32 %s1349_s22, 4  ;;  %s270_s14 = sshll.u32 %s1350_s12, 4  ;;  %s246_s9 = int_to_ptr.vmem [resolvable:$true] %s245_s9  ;;  %s271_s14 = int_to_ptr.vmem [resolvable:$true] %s270_s14 }
  0x53   : > { %s1146_s17 = scalar_lea.hbm %s1757_s2, 1024 }
  0x54   : > { %p1147_p13 = scmp.ne.s32.totalorder %s1757_s2, %s1146_s17  ;;  %p1153_p5 = scmp.lt.u32.totalorder %s1146_s17, %s1757_s2 }
  0x56   : > { %p1149_p0 = pnand %p1147_p13, %p1452_p8 }
  0x58   : > { %p1150_p2 = pneg %p1149_p0 }
  0x5a   : > { %p1155_p7 = pnand %p1153_p5, %p1150_p2 }
  0x5c   : > { %1158 = shalt.err (!%p1155_p7)
}
  0x5d   : > { %s1159_s13 = scalar_lea.vmem %s246_s9, 1024  ;;  %p1167_p11 = scmp.lt.s32.totalorder %s246_s9, %s246_s9 }
  0x5e   : > { %p1160_p9 = scmp.ne.s32.totalorder %s246_s9, %s1159_s13  ;;  %p1168_p12 = scmp.lt.s32.totalorder %s1159_s13, %s1159_s13 }
  0x60   : > { %p1162_p4 = pnand %p1160_p9, %p1452_p8  ;;  %p1169_p1 = por %p1168_p12, %p1167_p11 }
  0x62   : > { %p1163_p10 = pneg %p1162_p4 }
  0x64   : > { %p1170_p3 = pnand %p1169_p1, %p1163_p10 }
  0x66   : > { %1173 = shalt.err (!%p1170_p3)
}
  0x67   : > { %969 = dma.hbm_to_vmem [thread:$0]  (!%p1436_p6), %s1757_s2, 1024, %s246_s9, [#allocation6], %s1347_s23, %s1347_s23, %s1348_s28  }
  0x68   : > { %s1174_s16 = scalar_lea.hbm %s1759_s4, 32 }
  0x69   : > { %p1175_p1 = scmp.ne.s32.totalorder %s1759_s4, %s1174_s16  ;;  %p1181_p0 = scmp.lt.u32.totalorder %s1174_s16, %s1759_s4 }
  0x6b   : > { %p1177_p3 = pnand %p1175_p1, %p1452_p8 }
  0x6d   : > { %p1178_p13 = pneg %p1177_p3 }
  0x6f   : > { %p1183_p2 = pnand %p1181_p0, %p1178_p13 }
  0x71   : > { %1186 = shalt.err (!%p1183_p2)
}
  0x72   : > { %s1187_s21 = scalar_lea.vmem %s271_s14, 32  ;;  %p1195_p4 = scmp.lt.s32.totalorder %s271_s14, %s271_s14 }
  0x73   : > { %p1188_p5 = scmp.ne.s32.totalorder %s271_s14, %s1187_s21  ;;  %p1196_p10 = scmp.lt.s32.totalorder %s1187_s21, %s1187_s21 }
  0x75   : > { %p1190_p7 = pnand %p1188_p5, %p1452_p8  ;;  %p1197_p11 = por %p1196_p10, %p1195_p4 }
  0x77   : > { %p1191_p9 = pneg %p1190_p7 }
  0x79   : > { %p1198_p12 = pnand %p1197_p11, %p1191_p9 }
  0x7b   : > { %1201 = shalt.err (!%p1198_p12)
}
  0x7c   : > { %975 = dma.hbm_to_vmem [thread:$0]  (!%p1436_p6), %s1759_s4, 32, %s271_s14, [#allocation9]  }
  0x7d   : > { %s1351_s9 = smov [#allocation11]   ;;  %s1202_s12 = scalar_lea.hbm %s1760_s5, 32 }
  0x7e   : > { %s281_s13 = sshll.u32 %s1351_s9, 4  ;;  %p1203_p1 = scmp.ne.s32.totalorder %s1760_s5, %s1202_s12  ;;  %s282_s13 = int_to_ptr.vmem [resolvable:$true] %s281_s13 }
  0x7f   : > { %p1209_p0 = scmp.lt.u32.totalorder %s1202_s12, %s1760_s5 }
  0x80   : > { %p1205_p3 = pnand %p1203_p1, %p1452_p8 }
  0x82   : > { %p1206_p13 = pneg %p1205_p3 }
  0x84   : > { %p1211_p2 = pnand %p1209_p0, %p1206_p13 }
  0x86   : > { %1214 = shalt.err (!%p1211_p2)
}
  0x87   : > { %s1215_s14 = scalar_lea.vmem %s282_s13, 32  ;;  %p1223_p4 = scmp.lt.s32.totalorder %s282_s13, %s282_s13 }
  0x88   : > { %p1216_p5 = scmp.ne.s32.totalorder %s282_s13, %s1215_s14  ;;  %p1224_p10 = scmp.lt.s32.totalorder %s1215_s14, %s1215_s14 }
  0x8a   : > { %p1218_p7 = pnand %p1216_p5, %p1452_p8  ;;  %p1225_p11 = por %p1224_p10, %p1223_p4 }
  0x8c   : > { %p1219_p9 = pneg %p1218_p7 }
  0x8e   : > { %p1226_p12 = pnand %p1225_p11, %p1219_p9 }
  0x90   : > { %1229 = shalt.err (!%p1226_p12)
}
  0x91   : > { %978 = dma.hbm_to_vmem [thread:$0]  (!%p1436_p6), %s1760_s5, 32, %s282_s13, [#allocation12]  }
  0x92   : > { %s864_s19 = sadd.s32 4294967294, %s1342_s27   ;;  %s1584_s11 = sadd.s32 1, %s1342_s27  }
  0x93   : > { %s154_s21 = ssub.s32 %s1342_s27, %s1584_s11  ;;  %s157_s23 = sadd.s32 1, %s1338_s26 }
  0x94   : > { %p155_p8 = scmp.eq.s32.totalorder %s154_s21, 0  ;;  %p164_p1 = scmp.ne.s32.totalorder %s1338_s26, %s1334_s25 }
  0x95   : > { %p165_p3 = scmp.eq.s32.totalorder %s1342_s27, 0  ;;  %p170_p13 = scmp.ne.s32.totalorder %s1334_s25, %s1330_s24 }
  0x96   : > { %s1595_s28 = scalar_select %p155_p8, %s1338_s26, %s157_s23  }
  0x97   : > { %p1597_p0 = por %p165_p3, %p164_p1  ;;  %p1770_p2 = scmp.eq.s32.totalorder %s1420_s30, 0 }
  0x98   : > { %p194_p5 = scmp.eq.s32.totalorder %s1420_s30, 1  ;;  %p200_p7 = scmp.eq.s32.totalorder %s864_s19, 1 }
  0x99   : > { %p1603_p6 = por %p1770_p2, %p170_p13  ;;  %p993_p9 = scmp.lt.s32.totalorder %s1342_s27, 2 }
  0x9a   : > { %s292_s29 = sand.u32 1, %s1342_s27   ;;  %p1610_p4 = por %p194_p5, %p164_p1 }
  0x9b   : > { %p1614_p10 = por %p200_p7, %p170_p13  ;;  %s294_s15 = sand.u32 1, %s1338_s26  }
  0x9c   : > { %s1772_s22 = scalar_select %p1610_p4, 1, 0 }
  0x9d   : > { %s1773_s12 = scalar_select %p1614_p10, 1, 0 }
  0x9e   : > { %s873_s16 = sshll.u32 %s294_s15, 4  ;;  %s901_s17 = sshll.u32 %s1342_s27, 8 }
  0x9f   : > { %s1623_s20 = scalar_lea.hbm %s1761_s6, %s901_s17  ;;  %s296_s10 = scalar_lea.vmem [#allocation13], %s873_s16 }
  0xa0   : > { %s303_s19 = sshll.u32 %s296_s10, 4  ;;  %p1627_p11 = pnand %p993_p9, %p1597_p0  ;;  %s1631_s19 = int_to_ptr.vmem [resolvable:$true] %s303_s19 }
  0xa1   : > { %s1633_s23 = scalar_lea.sflag [#allocation3], %s292_s29  ;;  %s1230_s15 = scalar_lea.hbm %s1623_s20, 256 }
  0xa2   : > { %p1231_p12 = scmp.ne.s32.totalorder %s1623_s20, %s1230_s15  ;;  %p1232_p8 = pneg %p1627_p11 }
  0xa3   : > { %s1235_s17 = scalar_lea.hbm %s1761_s6, 512  ;;  %p1236_p13 = scmp.lt.u32.totalorder %s1623_s20, %s1761_s6 }
  0xa4   : > { %p1233_p1 = pnand %p1232_p8, %p1231_p12  ;;  %p1237_p0 = scmp.lt.u32.totalorder %s1235_s17, %s1230_s15 }
  0xa5   : > { %p1239_p5 = scmp.lt.u32.totalorder %s1230_s15, %s1623_s20 }
  0xa6   : > { %p1234_p3 = pneg %p1233_p1  ;;  %p1238_p2 = por %p1237_p0, %p1236_p13 }
  0xa8   : > { %p1240_p7 = por %p1239_p5, %p1238_p2 }
  0xaa   : > { %p1241_p9 = pnand %p1240_p7, %p1234_p3 }
  0xac   : > { %1244 = shalt.err (!%p1241_p9)
}
  0xad   : > { %s1245_s29 = scalar_lea.vmem %s1631_s19, 256  ;;  %s1352_s10 = smov [#allocation13]  }
  0xae   : > { %p1246_p12 = scmp.ne.s32.totalorder %s1631_s19, %s1245_s29  ;;  %s1250_s16 = sshll.u32 %s1352_s10, 4  ;;  %s1251_s16 = int_to_ptr.vmem [resolvable:$false] %s1250_s16 }
  0xaf   : > { %s1252_s9 = scalar_lea.vmem %s1251_s16, 512  ;;  %p1253_p4 = scmp.lt.s32.totalorder %s1631_s19, %s1251_s16 }
  0xb0   : > { %p1248_p1 = pnand %p1246_p12, %p1232_p8  ;;  %p1254_p13 = scmp.lt.s32.totalorder %s1252_s9, %s1245_s29 }
  0xb2   : > { %p1249_p10 = pneg %p1248_p1  ;;  %p1255_p0 = por %p1254_p13, %p1253_p4 }
  0xb4   : > { %p1256_p2 = pnand %p1255_p0, %p1249_p10 }
  0xb6   : > { %1259 = shalt.err (!%p1256_p2)
}
  0xb7   : > { %s1353_s15 = smov 128   ;;  %s1354_s17 = smov 8  }
  0xb8   : > { %982 = dma.hbm_to_vmem [thread:$0]  (!%p1627_p11), %s1623_s20, 256, %s1631_s19, %s1633_s23, %s1353_s15, %s1353_s15, %s1354_s17  }
  0xb9   : > { %p1775_p8 = scmp.ne.s32.totalorder %s1766_s8, 0 }
  0xba   : > { %p1776_p3 = scmp.eq.s32.totalorder (!%p1775_p8), %s1420_s30, 0 }
  0xbb   : > { %315 = sbr.rel (%p1775_p8) target bundleno = 485 (0x1e5), region = 48 }
  0xc2   : > { %1305 = dma.done.wait (%p1776_p3), [#allocation3], 1024   ;;  %p1777_p5 = pmov %p1776_p3 }
  0xc3   : > { %p1778_p4 = pmov %p1776_p3 }
  0xc4   : > { %1307 = vsyncadd (%p1777_p5), [#allocation3], 4294966272 }
  0xc5   : > { %1309 = dma.done.wait (%p1778_p4), [#allocation6], 2048   ;;  %p1779_p10 = pmov %p1776_p3 }
  0xc6   : > { %p1780_p7 = pmov %p1776_p3 }
  0xc7   : > { %1311 = vsyncadd (%p1779_p10), [#allocation6], 4294965248 }
  0xc8   : > { %1313 = dma.done.wait (%p1780_p7), [#allocation9], 64   ;;  %p1781_p11 = pmov %p1776_p3 }
  0xc9   : > { %p1782_p9 = pmov %p1776_p3 }
  0xca   : > { %1315 = vsyncadd (%p1781_p11), [#allocation9], 4294967232 }
  0xcb   : > { %1317 = dma.done.wait (%p1782_p9), [#allocation12], 32   ;;  %p1783_p12 = pmov %p1776_p3 }
  0xcc   : > { %s341_s8 = sand.u32 1, %s1420_s30   ;;  %s1681_s20 = sand.u32 1, %s1334_s25  }
  0xcd   : > { %1319 = vsyncadd (%p1783_p12), [#allocation12], 4294967264  ;;  %s883_s19 = sshll.u32 %s1681_s20, 4  ;;  %s342_s21 = scalar_lea.sflag [#allocation3], %s341_s8 }
  0xce   : > { %s1684_s23 = scalar_lea.vmem [#allocation13], %s883_s19 }
  0xcf   : > { %1321 = dma.done.wait (%p1603_p6), %s342_s21, 256  }
  0xd0   : > { %1323 = vsyncadd (%p1603_p6), %s342_s21, 4294967040  ;;  %v1355_v0 = vmov 0.0   ;;  %v485_v1 = vld [vmem:[#allocation5 + $0x8] sm:$0xff]  ;;  %v487_v2 = vld [vmem:[#allocation5 + $0x18] sm:$0xff]  ;;  %vm400_vm0 = vcmask 261120   ;;  %v390_v39 = vlaneseq  ;;  %s884_s13 = sshll.u32 %s1681_s20, 5 }
  0xd1   : > { %568 = vmatprep.mubr.f32.mxu1 %v1355_v0  ;;  %471 = vmatprep.mubr.f32.mxu0 %v1355_v0  ;;  %v484_v3 = vld [vmem:[#allocation5] sm:$0xff]  ;;  %v912_v4 = vpack.c.bf16 %v487_v2, %v485_v1  ;;  %v486_v5 = vld [vmem:[#allocation5 + $0x10] sm:$0xff]  ;;  %v489_v6 = vld [vmem:[#allocation5 + $0x28] sm:$0xff]  ;;  %s375_s18 = scalar_lea.vmem [#allocation14], %s884_s13  ;;  %vm715_vm1 = vcmask 523264   ;;  %s903_s29 = sshll.u32 %s1420_s30, 9 }
  0xd2   : > { %v491_v7 = vld [vmem:[#allocation5 + $0x38] sm:$0xff]  ;;  %v914_v8 = vpack.c.bf16 %v486_v5, %v484_v3  ;;  %v488_v10 = vld [vmem:[#allocation5 + $0x20] sm:$0xff]  ;;  %v490_v11 = vld [vmem:[#allocation5 + $0x30] sm:$0xff]  ;;  %v391_v40 = vshrl.u32 %v390_v39, 7  ;;  %s734_s14 = sshll.u32 %s375_s18, 4  ;;  %s1711_s9 = scalar_lea.hbm %s1762_s7, %s903_s29  ;;  %s1706_s14 = int_to_ptr.vmem [resolvable:$true] %s734_s14 }
  0xd3   : > { %v916_v9 = vpack.c.bf16 %v491_v7, %v489_v6  ;;  %913 = vmatprep.subr.bf16.mxu1 %v912_v4  ;;  %v381_v12 = vld [vmem:[#allocation2 + $0x8] sm:$0xff]  ;;  %v383_v13 = vld [vmem:[#allocation2 + $0x18] sm:$0xff]  ;;  %v918_v14 = vpack.c.bf16 %v490_v11, %v488_v10  ;;  %v380_v16 = vld [vmem:[#allocation2] sm:$0xff]  ;;  %s720_s15 = scalar_lea.sflag [#allocation4], %s1681_s20  ;;  %s1260_s30 = scalar_lea.vmem %s1706_s14, 512 }
  0xd4   : > { %915 = vmatpush1.bf16.msra.mxu1 %v914_v8  ;;  %v904_v15 = vpack.c.bf16 %v383_v13, %v381_v12  ;;  %v382_v17 = vld [vmem:[#allocation2 + $0x10] sm:$0xff]  ;;  %v385_v18 = vld [vmem:[#allocation2 + $0x28] sm:$0xff]  ;;  %v387_v20 = vld [vmem:[#allocation2 + $0x38] sm:$0xff]  ;;  %v392_v41 = vsub.s32 0, %v391_v40  ;;  %v396_v43 = vsub.s32 1, %v391_v40  ;;  %p1261_p6 = scmp.ne.s32.totalorder %s1706_s14, %s1260_s30  ;;  %p1784_p1 = scmp.ne.s32.totalorder %s1772_s22, 0 }
  0xd5   : > { %917 = vmatprep.subr.bf16.mxu1 %v916_v9  ;;  %v906_v19 = vpack.c.bf16 %v382_v17, %v380_v16  ;;  %v384_v21 = vld [vmem:[#allocation2 + $0x20] sm:$0xff]  ;;  %v386_v22 = vld [vmem:[#allocation2 + $0x30] sm:$0xff]  ;;  %v908_v23 = vpack.c.bf16 %v387_v20, %v385_v18  ;;  %v582_v24 = vld [vmem:[#allocation7 + $0x8] sm:$0xff]  ;;  %s1356_s17 = smov [#allocation14]  }
  0xd6   : > { %905 = vmatprep.subr.bf16.mxu0 %v904_v15  ;;  %v584_v25 = vld [vmem:[#allocation7 + $0x18] sm:$0xff]  ;;  %v910_v26 = vpack.c.bf16 %v386_v22, %v384_v21  ;;  %v581_v29 = vld [vmem:[#allocation7] sm:$0xff]  ;;  %v583_v30 = vld [vmem:[#allocation7 + $0x10] sm:$0xff]  ;;  %p1262_p13 = pnand %p1261_p6, %p1784_p1  ;;  %s1264_s8 = sshll.u32 %s1356_s17, 4  ;;  %s1265_s8 = int_to_ptr.vmem [resolvable:$false] %s1264_s8 }
  0xd7   : > { %907 = vmatpush1.bf16.msra.mxu0 %v906_v19  ;;  %v920_v27 = vpack.c.bf16 %v584_v25, %v582_v24  ;;  %v378_v28 = vld [vmem:[%s1684_s23] sm:$0xff]  ;;  %v922_v33 = vpack.c.bf16 %v583_v30, %v581_v29  ;;  %v379_v34 = vld [vmem:[%s1684_s23 + $0x8] sm:$0xff]  ;;  %s1266_s19 = scalar_lea.vmem %s1265_s8, 1024  ;;  %p1267_p2 = scmp.lt.s32.totalorder %s1706_s14, %s1265_s8 }
  0xd8   : > { %919 = vmatpush1.bf16.msra.mxu1 %v918_v14  ;;  %909 = vmatprep.subr.bf16.mxu0 %v908_v23  ;;  %v586_v31 = vld [vmem:[#allocation7 + $0x28] sm:$0xff]  ;;  %v588_v32 = vld [vmem:[#allocation7 + $0x38] sm:$0xff]  ;;  %v585_v36 = vld [vmem:[#allocation7 + $0x20] sm:$0xff]  ;;  %p1263_p0 = pneg %p1262_p13  ;;  %p1268_p8 = scmp.lt.s32.totalorder %s1266_s19, %s1260_s30 }
  0xd9   : > { %928 = vmatprep.subr.bf16.mxu1 %v920_v27  ;;  %v924_v35 = vpack.c.bf16 %v588_v32, %v586_v31  ;;  %v587_v37 = vld [vmem:[#allocation7 + $0x30] sm:$0xff]  ;;  %v492_v42 = vld [vmem:[#allocation10] sm:$0x3]  ;;  %v388_v9 = vld [vmem:[#allocation8] sm:$0x3] }
  0xda   : > { %v926_v38 = vpack.c.bf16 %v587_v37, %v585_v36  ;;  %v497_v44 = vrot.slane %v492_v42, %v392_v41  ;;  %v501_v45 = vrot.slane %v492_v42, %v396_v43  ;;  %v589_v10 = vld [vmem:[#allocation11] sm:$0x3]  ;;  %v393_v12 = vrot.slane %v388_v9, %v392_v41  ;;  %p1269_p3 = por %p1268_p8, %p1267_p2 }
  0xdb   : > { %887 = vmatmul.mubr.msk.f32.vlgmr.msra.gmra.mrb[0].mxu1 %vm400_vm0, %v378_v28  ;;  %911 = vmatpush1.bf16.msra.mxu0 %v910_v26  ;;  %v594_v13 = vrot.slane %v589_v10, %v392_v41  ;;  %v397_v14 = vrot.slane %v388_v9, %v396_v43  ;;  %v598_v15 = vrot.slane %v589_v10, %v396_v43 }
  0xdc   : > { %574 = vmatprep.mubr.f32.mxu1 %v1355_v0  ;;  %921 = vmatprep.subr.bf16.mxu0 %v920_v27  ;;  %p1270_p5 = pnand %p1269_p3, %p1263_p0 }
  0xdd   : > { %930 = vmatpush1.bf16.msra.mxu1 %v922_v33 }
  0xde   : > { %885 = vmatmul.mubr.msk.f32.vlgmr.msra.gmra.mrb[0].mxu0 %vm400_vm0, %v378_v28  ;;  %929 = vmatprep.subr.bf16.mxu1 %v924_v35 }
  0xdf   : > { %888 = vmatmul.mubr.msk.f32.gmra.mrb[2].mxu1 %vm400_vm0, %v379_v34  ;;  %923 = vmatpush1.bf16.msra.mxu0 %v922_v33 }
  0xe0   : > { %477 = vmatprep.mubr.f32.mxu0 %v1355_v0  ;;  %925 = vmatprep.subr.bf16.mxu0 %v924_v35 }
  0xe1   : > { %931 = vmatpush1.bf16.msra.mxu1 %v926_v38  ;;  %671 = vmatprep.mubr.f32.mxu1 %v1355_v0 }
  0xe2   : > { %886 = vmatmul.mubr.msk.f32.gmra.mrb[2].mxu0 %vm400_vm0, %v379_v34 }
  0xe3   : > { %927 = vmatpush1.bf16.msra.mxu0 %v926_v38  ;;  %665 = vmatprep.mubr.f32.mxu0 %v1355_v0 }
  0xe4   : > { %890 = vmatmul.mubr.msk.f32.vlgmr.msra.gmra.mrb[4].mxu1 %vm400_vm0, %v379_v34 }
  0xe6   : > { %889 = vmatmul.mubr.msk.f32.vlgmr.msra.gmra.mrb[4].mxu0 %vm400_vm0, %v378_v28 }
 0x1ae   : > { %v570_v46 = vpop.f32.mrb[0].mxu1 }
 0x1af   : > { %v571_v47 = vadd.f32 %v570_v46, %v497_v44  ;;  %v572_v48 = vpop.f32.mrb[1].mxu1 }
 0x1b0   : > { %v573_v49 = vadd.f32 %v572_v48, %v501_v45 }
 0x1b1   : > { %v891_v50 = vmul.f32 -1.442695, %v571_v47  ;;  %v473_v51 = vpop.f32.mrb[0].mxu0 }
 0x1b2   : > { %v892_v52 = vmul.f32 -1.442695, %v573_v49  ;;  %v576_v53 = vpop.f32.mrb[2].mxu1  ;;  %v475_v54 = vpop.f32.mrb[1].mxu0  ;;  %v474_v16 = vadd.f32 %v473_v51, %v393_v12 }
 0x1b3   : > { %1046 = vpow2.f32 %v891_v50  ;;  %v577_v55 = vadd.f32 %v576_v53, %v497_v44  ;;  %v578_v56 = vpop.f32.mrb[3].mxu1  ;;  %v476_v19 = vadd.f32 %v475_v54, %v397_v14 }
 0x1b4   : > { %1048 = vpow2.f32 %v892_v52  ;;  %v579_v57 = vadd.f32 %v578_v56, %v501_v45 }
 0x1b5   : > { %v893_v58 = vmul.f32 -1.442695, %v577_v55  ;;  %v479_v59 = vpop.f32.mrb[2].mxu0 }
 0x1b6   : > { %v894_v60 = vmul.f32 -1.442695, %v579_v57  ;;  %v481_v61 = vpop.f32.mrb[3].mxu0  ;;  %v480_v24 = vadd.f32 %v479_v59, %v393_v12 }
 0x1b7   : > { %1050 = vpow2.f32 %v893_v58  ;;  %v673_v62 = vpop.f32.mrb[4].mxu1  ;;  %v482_v28 = vadd.f32 %v481_v61, %v397_v14 }
 0x1b8   : > { %1052 = vpow2.f32 %v894_v60  ;;  %v675_v63 = vpop.f32.mrb[5].mxu1  ;;  %v674_v26 = vadd.f32 %v673_v62, %v594_v13 }
 0x1b9   : > { %v667_v0 = vpop.f32.mrb[4].mxu0  ;;  %v676_v30 = vadd.f32 %v675_v63, %v598_v15 }
 0x1ba   : > { %v669_v1 = vpop.f32.mrb[5].mxu0  ;;  %v668_v17 = vadd.f32 %v667_v0, %v594_v13 }
 0x1bb   : > { %v670_v20 = vadd.f32 %v669_v1, %v598_v15 }
 0x1bd   : > { %v1047_v2 = vpop.eup %1046 }
 0x1be   : > { %v1049_v3 = vpop.eup %1048  ;;  %v690_v4 = vadd.f32 1.0, %v1047_v2 }
 0x1bf   : > { %v691_v5 = vadd.f32 1.0, %v1049_v3 }
 0x1c0   : > { %1054 = vrcp.f32 %v690_v4 }
 0x1c1   : > { %v1051_v6 = vpop.eup %1050  ;;  %1056 = vrcp.f32 %v691_v5 }
 0x1c2   : > { %v1053_v7 = vpop.eup %1052  ;;  %v692_v8 = vadd.f32 1.0, %v1051_v6 }
 0x1c3   : > { %v693_v11 = vadd.f32 1.0, %v1053_v7 }
 0x1c4   : > { %1058 = vrcp.f32 %v692_v8 }
 0x1c5   : > { %1060 = vrcp.f32 %v693_v11 }
 0x1ca   : > { %v1055_v18 = vpop.eup %1054 }
 0x1cb   : > { %v1057_v21 = vpop.eup %1056  ;;  %v702_v22 = vmul.f32 %v1055_v18, %v474_v16 }
 0x1cc   : > { %v703_v23 = vmul.f32 %v1057_v21, %v476_v19 }
 0x1cd   : > { %v706_v25 = vadd.f32 %v702_v22, %v668_v17 }
 0x1ce   : > { %v1059_v27 = vpop.eup %1058  ;;  %v707_v29 = vadd.f32 %v703_v23, %v670_v20 }
 0x1cf   : > { %v1061_v31 = vpop.eup %1060  ;;  %v704_v32 = vmul.f32 %v1059_v27, %v480_v24  ;;  %v710_v33 = vmax.f32 %v706_v25, 0.0 }
 0x1d0   : > { %v705_v34 = vmul.f32 %v1061_v31, %v482_v28  ;;  %v711_v35 = vmax.f32 %v707_v29, 0.0 }
 0x1d1   : > { %714 = vst [vmem:[%s375_s18] sm:$0xff] %v710_v33  ;;  %v708_v36 = vadd.f32 %v704_v32, %v674_v26 }
 0x1d2   : > { %716 = vst.msk [vmem:[%s375_s18 + $0x8] sm:$0xff] %vm715_vm1, %v711_v35  ;;  %v709_v37 = vadd.f32 %v705_v34, %v676_v30 }
 0x1d3   : > { %v712_v38 = vmax.f32 %v708_v36, 0.0 }
 0x1d4   : > { %v713_v39 = vmax.f32 %v709_v37, 0.0 }
 0x1d5   : > { %717 = vst [vmem:[%s375_s18 + $0x10] sm:$0xff] %v712_v38 }
 0x1d6   : > { %718 = vst.msk [vmem:[%s375_s18 + $0x18] sm:$0xff] %vm715_vm1, %v713_v39 }
 0x1d7   : > { %1273 = shalt.err (!%p1270_p5)
}
 0x1d8   : > { %s1274_s21 = scalar_lea.hbm %s1711_s9, 512  ;;  %s1278_s18 = scalar_lea.hbm %s1762_s7, 1024 }
 0x1d9   : > { %p1275_p4 = scmp.ne.s32.totalorder %s1711_s9, %s1274_s21  ;;  %p1279_p11 = scmp.lt.u32.totalorder %s1711_s9, %s1762_s7 }
 0x1da   : > { %p1280_p9 = scmp.lt.u32.totalorder %s1278_s18, %s1274_s21  ;;  %p1282_p6 = scmp.lt.u32.totalorder %s1274_s21, %s1711_s9 }
 0x1db   : > { %p1276_p10 = pnand %p1275_p4, %p1784_p1 }
 0x1dc   : > { %p1281_p12 = por %p1280_p9, %p1279_p11 }
 0x1dd   : > { %p1277_p7 = pneg %p1276_p10 }
 0x1de   : > { %p1283_p13 = por %p1282_p6, %p1281_p12 }
 0x1e0   : > { %p1284_p0 = pnand %p1283_p13, %p1277_p7 }
 0x1e2   : > { %1287 = shalt.err (!%p1284_p0)
}
 0x1e3   : > { %s1357_s16 = smov 256   ;;  %s1358_s30 = smov 16  }
 0x1e4   : > { %958 = dma.vmem_to_hbm [thread:$0]  (%p1784_p1), %s1706_s14, 512, %s1711_s9, %s720_s15, %s1357_s16, %s1357_s16, %s1358_s30  }
 0x1e5 PF: > { %s749_s17 = sand.u32 1, %s1330_s24   ;;  %p1785_p2 = scmp.ne.s32.totalorder %s1773_s12, 0 }
 0x1e6   : > { %p1786_p8 = scmp.ge.s32.totalorder %s1342_s27, 2  ;;  %s750_s8 = scalar_lea.sflag [#allocation4], %s749_s17 }
 0x1e8   : > { %p984_p3 = pnand %p1786_p8, %p1785_p2 }
 0x1ea   : > { %1325 = dma.done.wait (!%p984_p3), %s750_s8, 512  }
 0x1eb   : > { %1327 = vsyncadd (!%p984_p3), %s750_s8, 4294966784  ;;  %p21_p5 = scmp.ge.s32.totalorder %s1584_s11, 4   ;;  %s1787_s24 = smov %s1334_s25 }
 0x1ec   : > { %s1788_s25 = smov %s1338_s26  ;;  %s1789_s26 = smov %s1595_s28 }
 0x1ed   : > { %s1790_s27 = smov %s1584_s11  ;;  %23 = sbr.rel (!%p21_p5) target bundleno = 7 (0x7), region = 116 }
 0x1f4   :  { %755 = vsyncpa [#allocation3], 1 }
 0x1f5   :  { %757 = vsyncpa [#allocation3 + $0x1], 1 }
 0x1f6   :  { %758 = vsyncpa [#allocation6], 1 }
 0x1f7   :  { %759 = vsyncpa [#allocation9], 1 }
 0x1f8   :  { %760 = vsyncpa [#allocation12], 1 }
 0x1f9   :  { %761 = vsyncpa [#allocation4], 1 }
 0x1fa   :  { %763 = vsyncpa [#allocation4 + $0x1], 1 }

</bundles_post_ra>
